<compile_context>
chip_gen: v5e
topology: v5e:2x2
jax: 0.10.0
libtpu: 0.0.40
codegen_flags: <defaults>
</compile_context>

<pallas_src>
import jax
import jax.numpy as jnp
from jax.experimental import pallas as pl
from jax.experimental.pallas import tpu as pltpu

TILE_B = 128  # examples per grid step (lane-dense last dim; multiple of 128)


def nutricare_kernel(fids_ref, dids_ref,          # (1, tile_b) int32 ids, VMEM
                     food_t_ref, dis_t_ref,       # (emb, food_size), (emb, disease_size), VMEM-resident
                     w_ref,                       # (emb, 2): col 0 = food half, col 1 = disease half
                     b_ref,                       # (1,) bias scalar in SMEM
                     out_ref):                    # (1, tile_b) probabilities
    emb, food_size = food_t_ref.shape
    dis_size = dis_t_ref.shape[1]
    tile_b = out_ref.shape[1]

    fid = fids_ref[...]                           # (1, tile_b)
    did = dids_ref[...]

    # One-hot gather masks: (vocab, tile_b).  Ids stay on the lane axis, so the
    # compare is a plain VPU broadcast (no relayout).  Padded / malformed ids
    # match no row -> zero embedding, later sliced off by the wrapper.
    food_iota = jax.lax.broadcasted_iota(jnp.int32, (food_size, tile_b), 0)
    dis_iota = jax.lax.broadcasted_iota(jnp.int32, (dis_size, tile_b), 0)
    onehot_f = (food_iota == fid).astype(jnp.float32)     # (food_size, tile_b)
    onehot_d = (dis_iota == did).astype(jnp.float32)      # (dis_size,  tile_b)

    # Coalesced gather: (emb, vocab) @ (vocab, tile_b) -> (emb, tile_b).
    food_vecs = jnp.dot(food_t_ref[...], onehot_f,
                        preferred_element_type=jnp.float32)
    dis_vecs = jnp.dot(dis_t_ref[...], onehot_d,
                       preferred_element_type=jnp.float32)

    # N=1 linear on concat([food, dis]) == food . w_food + dis . w_dis + b.
    # VPU broadcast-multiply + sublane reduce (XLU); stays off the MXU.
    w = w_ref[...]                                          # (emb, 2)
    contrib = food_vecs * w[:, 0:1] + dis_vecs * w[:, 1:2]  # (emb, tile_b)
    logits = jnp.sum(contrib, axis=0, keepdims=True) + b_ref[0]   # (1, tile_b)

    out_ref[...] = jax.nn.sigmoid(logits)                   # lane-dense write, once per tile


def nutricare_forward(food_ids, disease_ids, params, *, tile_b=TILE_B):
    B = food_ids.shape[0]
    food_emb = params["food_emb"]          # (food_size, emb)
    dis_emb = params["disease_emb"]        # (disease_size, emb)
    emb = food_emb.shape[1]

    b_pad = ((B + tile_b - 1) // tile_b) * tile_b
    num_tiles = b_pad // tile_b

    # Pad ids to the tile boundary; padded lanes are computed and sliced off.
    fids = jnp.pad(food_ids.astype(jnp.int32), (0, b_pad - B)).reshape(1, b_pad)
    dids = jnp.pad(disease_ids.astype(jnp.int32), (0, b_pad - B)).reshape(1, b_pad)

    # Layout plumbing (wrapper-side transpose, no compute hoisting): put emb on
    # sublanes and batch / vocab on lanes for the in-kernel compute.
    food_t = food_emb.T                    # (emb, food_size)
    dis_t = dis_emb.T                      # (emb, disease_size)
    w_t = params["w"].T                    # (emb, 2)

    food_size = food_t.shape[1]
    dis_size = dis_t.shape[1]

    cost = pl.CostEstimate(
        flops=int(b_pad * (2 * emb * (food_size + dis_size) + 4 * emb + 2)),
        transcendentals=int(b_pad),
        bytes_accessed=int(4 * (fids.size + dids.size + food_t.size
                                + dis_t.size + w_t.size + 1 + b_pad)),
    )

    grid_spec = pltpu.PrefetchScalarGridSpec(
        num_scalar_prefetch=0,
        grid=(num_tiles,),
        in_specs=[
            # Per-tile id slabs (lane-dense).
            pl.BlockSpec((1, tile_b), lambda t: (0, t)),
            pl.BlockSpec((1, tile_b), lambda t: (0, t)),
            # Tiny tables + weight slab, VMEM-resident for the whole grid
            # (full-extent blocks; a few KiB total).
            pl.BlockSpec(food_t.shape, lambda t: (0, 0)),
            pl.BlockSpec(dis_t.shape, lambda t: (0, 0)),
            pl.BlockSpec(w_t.shape, lambda t: (0, 0)),
            # Bias scalar on the scalar path.
            pl.BlockSpec(memory_space=pltpu.MemorySpace.SMEM),
        ],
        out_specs=pl.BlockSpec((1, tile_b), lambda t: (0, t)),
    )

    out = pl.pallas_call(
        nutricare_kernel,
        out_shape=jax.ShapeDtypeStruct((1, b_pad), jnp.float32),
        grid_spec=grid_spec,
        compiler_params=pltpu.CompilerParams(
            dimension_semantics=("parallel",),          # batch tiles shard across TCs on v7x
            vmem_limit_bytes=32 * 1024 * 1024),
        cost_estimate=cost,
    )(fids, dids, food_t, dis_t, w_t, params["b"])

    return out[0, :B]                                   # == torch .squeeze(1) -> (B,)


def init_params(key, food_size, disease_size, emb_dim=32):
    k1, k2, k3, k4 = jax.random.split(key, 4)
    return {
        "food_emb": jax.random.normal(k1, (food_size, emb_dim), jnp.float32),
        "disease_emb": jax.random.normal(k2, (disease_size, emb_dim), jnp.float32),
        # torch fc.weight is (1, 2*emb); stored here as (2, emb):
        # row 0 acts on the food half, row 1 on the disease half of the concat.
        "w": jax.random.normal(k3, (2, emb_dim), jnp.float32) * 0.1,
        "b": jax.random.normal(k4, (1,), jnp.float32) * 0.1,
    }


def reference_forward(food_ids, disease_ids, params):
    food_vec = params["food_emb"][food_ids]
    dis_vec = params["disease_emb"][disease_ids]
    x = jnp.concatenate([food_vec, dis_vec], axis=1)       # (B, 2*emb)
    w_flat = params["w"].reshape(-1)                       # torch (1, 2*emb) layout
    return jax.nn.sigmoid(x @ w_flat + params["b"][0])     # (B,)


if __name__ == "__main__":
    food_size, disease_size, emb_dim, batch = 16, 8, 32, 8
    key = jax.random.PRNGKey(0)
    kp, kf, kd = jax.random.split(key, 3)

    params = init_params(kp, food_size, disease_size, emb_dim)
    food_ids = jax.random.randint(kf, (batch,), 0, food_size, dtype=jnp.int32)
    disease_ids = jax.random.randint(kd, (batch,), 0, disease_size, dtype=jnp.int32)

    out = nutricare_forward(food_ids, disease_ids, params)
    out = jax.block_until_ready(out)

    ref = reference_forward(food_ids, disease_ids, params)
    assert out.shape == (batch,)
    assert jnp.allclose(out, ref, atol=1e-5, rtol=1e-5), (out, ref)

    print("KERNEL_OK")
</pallas_src>

<mosaic_0001>
module attributes {stable_mosaic.version = 11 : i64} {
  func.func @nutricare_kernel(%arg0: i32, %arg1: memref<1x128xi32, #tpu.memory_space<vmem>>, %arg2: memref<1x128xi32, #tpu.memory_space<vmem>>, %arg3: memref<32x16xf32, #tpu.memory_space<vmem>>, %arg4: memref<32x8xf32, #tpu.memory_space<vmem>>, %arg5: memref<32x2xf32, #tpu.memory_space<vmem>>, %arg6: memref<1xf32, #tpu.memory_space<smem>>, %arg7: memref<1x128xf32, #tpu.memory_space<vmem>>) attributes {dimension_semantics = [#tpu.dimension_semantics<parallel>], iteration_bounds = array<i64: 1>, scalar_prefetch = 0 : i64, scratch_operands = 0 : i64, tpu.core_type = #tpu.core_type<tc>, window_params = [{transform_indices = @transform_0, window_bounds = array<i64: 1, 128>}, {transform_indices = @transform_1, window_bounds = array<i64: 1, 128>}, {pipeline_mode = #tpu.pipeline_mode<synchronous>, transform_indices = @transform_2, window_bounds = array<i64: 32, 16>}, {pipeline_mode = #tpu.pipeline_mode<synchronous>, transform_indices = @transform_3, window_bounds = array<i64: 32, 8>}, {pipeline_mode = #tpu.pipeline_mode<synchronous>, transform_indices = @transform_4, window_bounds = array<i64: 32, 2>}, {transform_indices = @transform_5, window_bounds = array<i64: 1>}, {transform_indices = @transform_6, window_bounds = array<i64: 1, 128>}]} {
    %c0 = arith.constant 0 : index
    %c0_0 = arith.constant 0 : index
    %0 = vector.load %arg1[%c0, %c0_0] : memref<1x128xi32, #tpu.memory_space<vmem>>, vector<1x128xi32>
    %c0_1 = arith.constant 0 : index
    %c0_2 = arith.constant 0 : index
    %1 = vector.load %arg2[%c0_1, %c0_2] : memref<1x128xi32, #tpu.memory_space<vmem>>, vector<1x128xi32>
    %2 = tpu.iota {dimensions = array<i32: 0>} : vector<16x128xi32>
    %3 = tpu.iota {dimensions = array<i32: 0>} : vector<8x128xi32>
    %4 = vector.broadcast %0 : vector<1x128xi32> to vector<16x128xi32>
    %5 = arith.cmpi eq, %2, %4 : vector<16x128xi32>
    %6 = arith.extui %5 : vector<16x128xi1> to vector<16x128xi32>
    %7 = arith.sitofp %6 : vector<16x128xi32> to vector<16x128xf32>
    %8 = vector.broadcast %1 : vector<1x128xi32> to vector<8x128xi32>
    %9 = arith.cmpi eq, %3, %8 : vector<8x128xi32>
    %10 = arith.extui %9 : vector<8x128xi1> to vector<8x128xi32>
    %11 = arith.sitofp %10 : vector<8x128xi32> to vector<8x128xf32>
    %c0_3 = arith.constant 0 : index
    %c0_4 = arith.constant 0 : index
    %12 = vector.load %arg3[%c0_3, %c0_4] : memref<32x16xf32, #tpu.memory_space<vmem>>, vector<32x16xf32>
    %cst = arith.constant dense<0.000000e+00> : vector<32x128xf32>
    %13 = tpu.matmul %12, %7, %cst {dimension_numbers = #tpu.dot_dimension_numbers<[1], [0], [0], [1], [0, 0, 1, 1], [], []>} : vector<32x16xf32>, vector<16x128xf32>, vector<32x128xf32> -> vector<32x128xf32>
    %c0_5 = arith.constant 0 : index
    %c0_6 = arith.constant 0 : index
    %14 = vector.load %arg4[%c0_5, %c0_6] : memref<32x8xf32, #tpu.memory_space<vmem>>, vector<32x8xf32>
    %cst_7 = arith.constant dense<0.000000e+00> : vector<32x128xf32>
    %15 = tpu.matmul %14, %11, %cst_7 {dimension_numbers = #tpu.dot_dimension_numbers<[1], [0], [0], [1], [0, 0, 1, 1], [], []>} : vector<32x8xf32>, vector<8x128xf32>, vector<32x128xf32> -> vector<32x128xf32>
    %c0_8 = arith.constant 0 : index
    %c0_9 = arith.constant 0 : index
    %16 = vector.load %arg5[%c0_8, %c0_9] : memref<32x2xf32, #tpu.memory_space<vmem>>, vector<32x2xf32>
    %17 = vector.extract_strided_slice %16 {offsets = [0, 0], sizes = [32, 1], strides = [1, 1]} : vector<32x2xf32> to vector<32x1xf32>
    %18 = vector.broadcast %17 : vector<32x1xf32> to vector<32x128xf32>
    %19 = arith.mulf %13, %18 : vector<32x128xf32>
    %20 = vector.extract_strided_slice %16 {offsets = [0, 1], sizes = [32, 1], strides = [1, 1]} : vector<32x2xf32> to vector<32x1xf32>
    %21 = vector.broadcast %20 : vector<32x1xf32> to vector<32x128xf32>
    %22 = arith.mulf %15, %21 : vector<32x128xf32>
    %23 = arith.addf %19, %22 : vector<32x128xf32>
    %cst_10 = arith.constant dense<0.000000e+00> : vector<128xf32>
    %24 = vector.multi_reduction <add>, %23, %cst_10 [0] : vector<32x128xf32> to vector<128xf32>
    %25 = vector.shape_cast %24 : vector<128xf32> to vector<1x128xf32>
    %c0_11 = arith.constant 0 : index
    %26 = memref.load %arg6[%c0_11] : memref<1xf32, #tpu.memory_space<smem>>
    %27 = vector.broadcast %26 : f32 to vector<1x128xf32>
    %28 = arith.addf %25, %27 : vector<1x128xf32>
    %29 = arith.negf %28 : vector<1x128xf32>
    %30 = math.exp %29 : vector<1x128xf32>
    %cst_12 = arith.constant 1.000000e+00 : f32
    %31 = vector.broadcast %cst_12 : f32 to vector<1x128xf32>
    %32 = arith.addf %31, %30 : vector<1x128xf32>
    %33 = arith.divf %31, %32 : vector<1x128xf32>
    %c0_13 = arith.constant 0 : index
    %c0_14 = arith.constant 0 : index
    %34 = vector.load %arg7[%c0_13, %c0_14] : memref<1x128xf32, #tpu.memory_space<vmem>>, vector<1x128xf32>
    tpu.vector_store %arg7[%c0_13, %c0_14], %33 {strides = array<i32>} : memref<1x128xf32, #tpu.memory_space<vmem>>, vector<1x128xf32>,
    return
  }
  func.func @transform_0(%arg0: i32) -> (i32, i32) {
    %c0_i32 = arith.constant 0 : i32
    %c0_i32_0 = arith.constant 0 : i32
    return %c0_i32, %arg0 : i32, i32
  }
  func.func @transform_1(%arg0: i32) -> (i32, i32) {
    %c0_i32 = arith.constant 0 : i32
    %c0_i32_0 = arith.constant 0 : i32
    return %c0_i32, %arg0 : i32, i32
  }
  func.func @transform_2(%arg0: i32) -> (i32, i32) {
    %c0_i32 = arith.constant 0 : i32
    %c0_i32_0 = arith.constant 0 : i32
    %c0_i32_1 = arith.constant 0 : i32
    return %c0_i32, %c0_i32_0 : i32, i32
  }
  func.func @transform_3(%arg0: i32) -> (i32, i32) {
    %c0_i32 = arith.constant 0 : i32
    %c0_i32_0 = arith.constant 0 : i32
    %c0_i32_1 = arith.constant 0 : i32
    return %c0_i32, %c0_i32_0 : i32, i32
  }
  func.func @transform_4(%arg0: i32) -> (i32, i32) {
    %c0_i32 = arith.constant 0 : i32
    %c0_i32_0 = arith.constant 0 : i32
    %c0_i32_1 = arith.constant 0 : i32
    return %c0_i32, %c0_i32_0 : i32, i32
  }
  func.func @transform_5(%arg0: i32) -> i32 {
    %c0_i32 = arith.constant 0 : i32
    %c0_i32_0 = arith.constant 0 : i32
    return %c0_i32 : i32
  }
  func.func @transform_6(%arg0: i32) -> (i32, i32) {
    %c0_i32 = arith.constant 0 : i32
    %c0_i32_0 = arith.constant 0 : i32
    return %c0_i32, %arg0 : i32, i32
  }
}

</mosaic_0001>

<bundles_post_ra>
// kernel: tpu_custom_call.1
= control target key start
LH: loop header
LB: loop body
LE: loop exit
PB: predicated region body
PF: predicated region fallthrough
CT: control target
= control target key end

     0   :  { %v27_v0 = vlaneseq  ;;  %v292_v2 = vmov 1   ;;  %v293_v5 = vmov 0   ;;  %vm91_vm0 = vcmask 64512   ;;  %s387_s0 = inlined_call_operand.vmem [shape: s32[1,128], index: 0, kind: input, shape index: {}]   ;;  %s388_s1 = inlined_call_operand.vmem [shape: s32[1,128], index: 1, kind: input, shape index: {}]   ;;  %s389_s2 = inlined_call_operand.vmem [shape: f32[32,16], index: 2, kind: input, shape index: {}]   ;;  %s390_s3 = inlined_call_operand.vmem [shape: f32[32,8], index: 3, kind: input, shape index: {}]   ;;  %s391_s4 = inlined_call_operand.vmem [shape: f32[32,2], index: 4, kind: input, shape index: {}]   ;;  %s392_s5 = inlined_call_operand.<no memory space> [shape: f32[1], index: 5, kind: input, shape index: {}]   ;;  %s393_s6 = inlined_call_operand.hbm [shape: f32[1,128], index: 6, kind: output, shape index: {}]  }
   0x1   :  { %v260_v1 = vld [vmem:[%s388_s1] ss:$0 sm:$0xff]  ;;  %256 = vset.pattern.permute.xlu1 %v292_v2  ;;  %255 = vset.pattern.permute.xlu0 %v293_v5  ;;  %v88_v7 = vld [vmem:[%s390_s3 + $0x8] sm:$0xff]  ;;  %v294_v10 = vmov 1.0   ;;  %v135_v11 = vld [vmem:[%s391_s4 + $0x10] sm:$0xff] }
   0x2   :  { %v133_v3 = vld [vmem:[%s391_s4] sm:$0xff]  ;;  %v28_v4 = vshrl.u32 %v27_v0, 7  ;;  %257 = vset.pattern.permute.xlu2 %v293_v5 }
   0x3   :  { %162 = vperm.xlu1 %256, %v133_v3   ;;  %v261_v6 = vld [vmem:[%s387_s0] ss:$0 sm:$0xff]  ;;  %139 = vperm.xlu0 %255, %v133_v3  }
   0x4   :  { %v87_v8 = vld [vmem:[%s390_s3] sm:$0xff]  ;;  %vm38_vm1 = vcmp.eq.s32.totalorder %v28_v4, %v260_v1  ;;  %v29_v9 = vadd.s32 8, %v28_v4 }
   0x5   :  { %250 = vmatpush.msk.msra.mxu3 %vm38_vm1, %v294_v10  ;;  %242 = vmatpush.msk.msra.mxu1 %vm38_vm1, %v294_v10 }
   0x6   :  { %12 = vsyncpa [#allocation4], 0  ;;  %244 = vmatmul.msk.f32.vlgmr.msra.gmra.mxu3 %vm91_vm0, %v88_v7  ;;  %vm32_vm2 = vcmp.eq.s32.totalorder %v29_v9, %v261_v6  ;;  %vm31_vm3 = vcmp.eq.s32.totalorder %v28_v4, %v261_v6  ;;  %243 = vmatmul.msk.f32.vlgmr.msra.gmra.mxu1 %vm91_vm0, %v87_v8  ;;  %v41_v12 = vld [vmem:[%s389_s2] sm:$0xff]  ;;  %vm45_vm4 = vcmask 130048   ;;  %v43_v13 = vld [vmem:[%s389_s2 + $0x10] sm:$0xff]  ;;  %v195_v56 = vstv %s392_s5  ;;  %s224_s5 = sshll.u32 %s393_s6, 4  ;;  %s225_s5 = int_to_ptr.hbm [resolvable:$true] %s224_s5 }
   0x7   :  { %236 = vmatpush.msk.msra.mxu0 %vm32_vm2, %v294_v10  ;;  %248 = vmatpush.msk.msra.mxu2 %vm32_vm2, %v294_v10  ;;  %v134_v14 = vld [vmem:[%s391_s4 + $0x8] sm:$0xff]  ;;  %v89_v15 = vld [vmem:[%s390_s3 + $0x10] sm:$0xff]  ;;  %v44_v17 = vld [vmem:[%s389_s2 + $0x18] sm:$0xff] }
   0x8   :  { %149 = vperm.xlu2 %257, %v135_v11   ;;  %v42_v16 = vld [vmem:[%s389_s2 + $0x8] sm:$0xff]  ;;  %v136_v18 = vld [vmem:[%s391_s4 + $0x18] sm:$0xff]  ;;  %s295_s4 = smov [#allocation3]  }
   0x9   :  { %237 = vmatpush.msk.msra.mxu0 %vm31_vm3, %v294_v10  ;;  %249 = vmatpush.msk.msra.mxu2 %vm31_vm3, %v294_v10  ;;  %v90_v19 = vld [vmem:[%s390_s3 + $0x18] sm:$0xff]  ;;  %s222_s23 = sshll.u32 %s295_s4, 4  ;;  %s223_s23 = int_to_ptr.vmem [resolvable:$true] %s222_s23 }
   0xa   :  { %238 = vmatmul.msk.f32.vlgmr.msra.gmra.mxu0 %vm45_vm4, %v41_v12  ;;  %240 = vmatmul.msk.f32.vlgmr.msra.gmra.mxu2 %vm45_vm4, %v43_v13 }
   0xb   :  { %166 = vperm.xlu1 %256, %v134_v14   ;;  %144 = vperm.xlu0 %255, %v134_v14  }
   0xe   :  { %245 = vmatmul.msk.f32.gmra.mxu3 %vm91_vm0, %v89_v15 }
  0x10   :  { %258 = vset.pattern.permute.xlu2 %v292_v2 }
  0x11   :  { %170 = vperm.xlu2 %258, %v135_v11  }
  0x12   :  { %239 = vmatmul.msk.f32.gmra.mxu0 %vm45_vm4, %v42_v16  ;;  %241 = vmatmul.msk.f32.gmra.mxu2 %vm45_vm4, %v44_v17 }
  0x13   :  { %174 = vperm.xlu1 %256, %v136_v18   ;;  %154 = vperm.xlu0 %255, %v136_v18  }
  0x16   :  { %246 = vmatmul.msk.f32.gmra.mxu3 %vm91_vm0, %v90_v19 }
  0x1b   :  { %259 = vset.pattern.permute.xlu0 %v292_v2 }
  0x62   :  { %v150_v23 = vpop.permute.xlu2 %149 }
  0x6b   :  { %v171_v31 = vpop.permute.xlu2 %170 }
  0x75   :  { %v163_v20 = vpop.permute.xlu1 %162  ;;  %v140_v21 = vpop.permute.xlu0 %139 }
  0x7d   :  { %v167_v26 = vpop.permute.xlu1 %166  ;;  %v145_v27 = vpop.permute.xlu0 %144 }
  0x83   :  { %v121_v28 = vpop.f32.mrf.mxu1 }
  0x84   :  { %v177_v34 = vmul.f32 %v163_v20, %v121_v28 }
  0x85   :  { %v175_v41 = vpop.permute.xlu1 %174  ;;  %v155_v44 = vpop.permute.xlu0 %154 }
  0x87   :  { %v75_v22 = vpop.f32.mrf.mxu0 }
  0x88   :  { %v157_v33 = vmul.f32 %v140_v21, %v75_v22 }
  0x89   :  { %v124_v24 = vpop.f32.mrf.mxu3 }
  0x8a   :  { %v178_v35 = vmul.f32 %v167_v26, %v124_v24  ;;  %v181_v38 = vadd.f32 %v177_v34, %v157_v33 }
  0x8d   :  { %v81_v25 = vpop.f32.mrf.mxu2 }
  0x8e   :  { %v159_v39 = vmul.f32 %v150_v23, %v81_v25 }
  0x8f   :  { %v78_v29 = vpop.f32.mrf.mxu0 }
  0x90   :  { %v158_v30 = vmul.f32 %v145_v27, %v78_v29 }
  0x91   :  { %v127_v32 = vpop.f32.mrf.mxu3 }
  0x92   :  { %v182_v36 = vadd.f32 %v178_v35, %v158_v30  ;;  %v179_v37 = vmul.f32 %v171_v31, %v127_v32 }
  0x94   :  { %v185_v42 = vadd.f32 %v182_v36, %v181_v38  ;;  %v183_v43 = vadd.f32 %v179_v37, %v159_v39 }
  0x95   :  { %v84_v40 = vpop.f32.mrf.mxu2 }
  0x96   :  { %v160_v46 = vmul.f32 %v155_v44, %v84_v40  ;;  %v186_v48 = vadd.f32 %v185_v42, %v183_v43 }
  0x99   :  { %v130_v45 = vpop.f32.mrf.mxu3 }
  0x9a   :  { %v180_v47 = vmul.f32 %v175_v41, %v130_v45 }
  0x9c   :  { %v184_v49 = vadd.f32 %v180_v47, %v160_v46 }
  0x9e   :  { %v187_v50 = vadd.f32 %v186_v48, %v184_v49 }
  0xa0   :  { %v188_v51 = vrot.slane %v187_v50, 4 }
  0xa2   :  { %v189_v52 = vadd.f32 %v188_v51, %v187_v50 }
  0xa4   :  { %v190_v53 = vrot.slane %v189_v52, 2 }
  0xa6   :  { %v191_v54 = vadd.f32 %v190_v53, %v189_v52 }
  0xa8   :  { %v192_v55 = vrot.slane %v191_v54, 1 }
  0xaa   :  { %v193_v57 = vadd.f32 %v192_v55, %v191_v54 }
  0xac   :  { %v196_v58 = vadd.f32 %v195_v56, %v193_v57 }
  0xae   :  { %v247_v59 = vmul.f32 -1.442695, %v196_v58 }
  0xb0   :  { %262 = vpow2.f32 %v247_v59 }
  0xb6   :  { %v263_v60 = vpop.eup %262 }
  0xb7   :  { %v200_v61 = vadd.f32 1.0, %v263_v60 }
  0xb9   :  { %264 = vrcp.f32 %v200_v61  ;;  %v212_v1 = vand.u32 2147483648, %v200_v61  ;;  %v210_v3 = vand.u32 2147483647, %v200_v61  ;;  %vm206_vm6 = vweird.f32 %v200_v61 }
  0xbb   :  { %v213_v5 = vor.u32 1.1754944e-38, %v212_v1  ;;  %vm211_vm8 = vcmp.eq.f32.partialorder %v210_v3, 8.507059e+37 }
  0xbf   :  { %v265_v62 = vpop.eup %264 }
  0xc0   :  { %v202_v63 = vmul.f32 %v265_v62, %v200_v61  ;;  %vm207_vm5 = vweird.f32 %v265_v62 }
  0xc1   :  { %vm208_vm7 = vmor %vm206_vm6, %vm207_vm5 }
  0xc2   :  { %v203_v0 = vsub.f32 1.0, %v202_v63 }
  0xc4   :  { %v204_v2 = vmul.f32 %v265_v62, %v203_v0 }
  0xc6   :  { %v205_v4 = vadd.f32 %v265_v62, %v204_v2 }
  0xc8   :  { %v209_v6 = vsel %vm208_vm7, %v265_v62, %v205_v4 }
  0xc9   :  { %v214_v7 = vsel %vm211_vm8, %v213_v5, %v209_v6 }
  0xca   :  { %216 = vst [vmem:[#allocation3] sm:$0x1] %v214_v7 }
  0xcb   :  { %227 = dma.vmem_to_hbm [thread:$0]  %s223_s23, 16, %s225_s5, [#allocation4]  }
  0xcc   :  { %290 = dma.done.wait [#allocation4], 16  }
  0xcd   :  { %291 = vsyncadd [#allocation4], 4294967280 }
  0xce   :  { %232 = vsyncpa [#allocation4], 1 }

</bundles_post_ra>
